<compile_context>
chip_gen: v6e
topology: v6e:2x2x1
jax: 0.10.0
libtpu: 0.0.40
codegen_flags: <defaults>
</compile_context>

<pallas_src>
import math
from functools import partial

import jax
import jax.numpy as jnp
from jax.experimental import pallas as pl
from jax.experimental.pallas import tpu as pltpu


def _round_up(a, b):
    return (a + b - 1) // b * b


def _vmem_capacity_bytes():
    """Physical VMEM per TensorCore; conservative 64 MiB (v7x-sized) fallback."""
    try:
        info = pltpu.get_tpu_info()
        cap = int(info.vmem_capacity_bytes)
        if cap > 0:
            return cap
    except Exception:
        pass
    return 64 * 2**20


def _pick_td(Do, HoWo):
    """Output d-slices per grid step.

    Smallest legal td is best here: the per-step x block is already a full
    (Cin, 2*H*W) slab, the pool-matrix footprint and pool-matmul flops grow with
    td, and more grid steps keeps both v7x TensorCores fed.  Legality: the output
    block's lane width td*Ho*Wo must be a multiple of 128, or td == Do (block
    spans the full last dim, always legal).
    """
    for td in range(1, Do):
        if Do % td == 0 and (td * HoWo) % 128 == 0:
            return td
    return Do


def _transition_kernel(x_ref, bn_ref, p_ref, w_ref, o_ref, *, matmul_dtype):
    # x_ref:  (1, Cin, Lb)     channels-first tile, Lb = td*2*H*W, native dtype
    # bn_ref: (Cin, 2)         col 0 = folded BN scale, col 1 = folded BN shift (f32)
    # p_ref:  (Lb, Lo)         0/1 pool-window matrix, Lo = td*Ho*Wo
    # w_ref:  (Cout_p, Cin)    1x1x1 conv weight, 1/8 pool factor folded in
    # o_ref:  (1, Cout_p, Lo)  channels-first output tile
    x = x_ref[0].astype(jnp.float32)                  # (Cin, Lb)
    scale = bn_ref[:, 0:1]                            # (Cin, 1)
    shift = bn_ref[:, 1:2]                            # (Cin, 1)
    y = jnp.maximum(x * scale + shift, 0.0)           # BN affine + ReLU (VPU, f32)
    if matmul_dtype is not None:
        y = y.astype(matmul_dtype)
    # 2x2x2 pool-window sum on the MXU (on-chip reorganization, no HBM shuffle).
    pooled = jnp.dot(y, p_ref[...], preferred_element_type=jnp.float32)  # (Cin, Lo)
    if matmul_dtype is not None:
        pooled = pooled.astype(matmul_dtype)
    # 1x1x1 conv (channels-first output).
    out = jnp.dot(w_ref[...], pooled, preferred_element_type=jnp.float32)  # (Cout_p, Lo)
    o_ref[0] = out.astype(o_ref.dtype)


def transition_block3d(x, gamma, beta, conv_w, eps=1e-5, matmul_dtype=None):
    """BN(train stats) -> ReLU -> 1x1x1 conv (no bias) -> 2x2x2 avg-pool.

    x: (N, Cin, D, H, W) float32/bfloat16; conv_w: (Cout, Cin, 1, 1, 1).
    Returns (N, Cout, D//2, H//2, W//2) in x.dtype.
    """
    assert x.ndim == 5, x.shape
    N, Cin, D, H, W = x.shape
    Cout = conv_w.shape[0]
    assert conv_w.shape[1] == Cin, (conv_w.shape, Cin)
    assert D % 2 == 0 and H % 2 == 0 and W % 2 == 0, "even spatial dims expected"
    Do, Ho, Wo = D // 2, H // 2, W // 2
    HoWo = Ho * Wo

    # --- one-pass BN batch statistics (training semantics, biased variance). ---
    # Note: E[x^2] - mean^2 can lose precision for data with |mean| >> std; the
    # single pass is kept deliberately (it is the only extra HBM read of x left).
    xf = x.astype(jnp.float32)
    mean = jnp.mean(xf, axis=(0, 2, 3, 4))
    mean_sq = jnp.mean(jnp.square(xf), axis=(0, 2, 3, 4))
    var = jnp.maximum(mean_sq - jnp.square(mean), 0.0)
    scale = gamma.astype(jnp.float32) / jnp.sqrt(var + eps)
    shift = beta.astype(jnp.float32) - mean * scale
    bn = jnp.stack([scale, shift], axis=1)                       # (Cin, 2), merged

    matmul_np = jnp.float32 if matmul_dtype is None else matmul_dtype

    # --- block geometry (no data movement: metadata-only reshapes of x). ---
    td = _pick_td(Do, HoWo)
    Lb = td * 2 * H * W           # input lanes per step (d-pairs * H * W)
    Lo = td * HoWo                # output lanes per step
    grid = (N, Do // td)

    # --- constant 0/1 pool-window matrix (pool-window reorg done on the MXU). ---
    l = jnp.arange(Lb)
    dj_l = l // (2 * H * W)                    # local output-d index
    sp = l % (H * W)                           # position inside one d-slice
    ho_l = (sp // W) // 2
    wo_l = (sp % W) // 2
    m = jnp.arange(Lo)
    dj_m = m // HoWo
    ho_m = (m % HoWo) // Wo
    wo_m = m % Wo
    pool_mat = ((dj_l[:, None] == dj_m[None, :])
                & (ho_l[:, None] == ho_m[None, :])
                & (wo_l[:, None] == wo_m[None, :])).astype(matmul_np)   # (Lb, Lo)

    # --- conv weight, 1/8 pool factor folded in; Cout padded to a sublane mult. ---
    Cout_p = _round_up(Cout, 8)
    w2d = conv_w.reshape(Cout, Cin).astype(jnp.float32) * 0.125
    w2d = jnp.pad(w2d, ((0, Cout_p - Cout), (0, 0))).astype(matmul_np)  # (Cout_p, Cin)

    x3 = x.reshape(N, Cin, D * H * W)          # free view: channels-first, no copy
    out_dtype = x.dtype

    # --- VMEM accounting (constants counted double-buffered), generation-gated. ---
    in_item = jnp.dtype(x.dtype).itemsize
    p_item = jnp.dtype(matmul_np).itemsize
    out_item = jnp.dtype(out_dtype).itemsize
    cin_s = _round_up(Cin, 8)
    Lb_l = _round_up(Lb, 128)
    Lo_l = _round_up(Lo, 128)
    vmem_needed = (2 * cin_s * Lb_l * in_item                 # x blocks (dbl-buffered)
                   + 2 * Cout_p * Lo_l * out_item             # out blocks (dbl-buffered)
                   + 2 * _round_up(Lb, 8) * Lo_l * p_item     # pool matrix (count 2x)
                   + 2 * Cout_p * _round_up(Cin, 128) * p_item  # conv weight (count 2x)
                   + 2 * cin_s * 128 * 4)                     # merged BN params (2x)
    vmem_cap = _vmem_capacity_bytes()
    cap_limit = max(32 * 2**20, vmem_cap - 16 * 2**20)        # <=48 MiB on v7x parts
    vmem_limit = int(min(cap_limit, max(32 * 2**20, vmem_needed + (8 << 20))))

    out_flat = pl.pallas_call(
        partial(_transition_kernel, matmul_dtype=matmul_dtype),
        out_shape=jax.ShapeDtypeStruct((N, Cout_p, Do * HoWo), out_dtype),
        grid_spec=pltpu.PrefetchScalarGridSpec(
            num_scalar_prefetch=0,
            grid=grid,
            in_specs=[
                pl.BlockSpec((1, Cin, Lb), lambda n, j: (n, 0, j)),
                pl.BlockSpec((Cin, 2), lambda n, j: (0, 0)),
                pl.BlockSpec((Lb, Lo), lambda n, j: (0, 0)),
                pl.BlockSpec((Cout_p, Cin), lambda n, j: (0, 0)),
            ],
            out_specs=pl.BlockSpec((1, Cout_p, Lo), lambda n, j: (n, 0, j)),
        ),
        compiler_params=pltpu.CompilerParams(
            dimension_semantics=("parallel", "parallel"),
            vmem_limit_bytes=vmem_limit),
    )(x3, bn, pool_mat, w2d)

    # Channels-first output: only a metadata reshape (and a tiny slice iff padded).
    out = out_flat if Cout_p == Cout else out_flat[:, :Cout, :]
    return out.reshape(N, Cout, Do, Ho, Wo)


def _reference(x, gamma, beta, conv_w, eps=1e-5):
    """Pure-JAX reference mimicking the PyTorch forward exactly."""
    x = x.astype(jnp.float32)
    mean = jnp.mean(x, axis=(0, 2, 3, 4))
    var = jnp.mean(jnp.square(x - mean[None, :, None, None, None]), axis=(0, 2, 3, 4))
    xn = (x - mean[None, :, None, None, None]) / jnp.sqrt(var + eps)[None, :, None, None, None]
    y = jnp.maximum(xn * gamma[None, :, None, None, None] + beta[None, :, None, None, None], 0.0)
    w2d = conv_w.reshape(conv_w.shape[0], conv_w.shape[1])        # (Cout, Cin)
    z = jnp.einsum('ncdhw,oc->nodhw', y, w2d)                     # 1x1x1 conv, no bias
    N, Cout, D, H, W = z.shape
    z = z.reshape(N, Cout, D // 2, 2, H // 2, 2, W // 2, 2)
    return z.mean(axis=(3, 5, 7))


if __name__ == "__main__":
    key = jax.random.PRNGKey(0)
    k_x, k_g, k_b, k_w = jax.random.split(key, 4)

    # ---- Config A: main path (td=2 -> grid (2, 2): 4 even parallel steps). ----
    N, Cin, Cout, D, H, W = 2, 16, 8, 8, 16, 16
    x = jax.random.normal(k_x, (N, Cin, D, H, W), dtype=jnp.float32)
    gamma = 1.0 + 0.1 * jax.random.normal(k_g, (Cin,), dtype=jnp.float32)
    beta = 0.1 * jax.random.normal(k_b, (Cin,), dtype=jnp.float32)
    bound = 1.0 / math.sqrt(Cin)  # PyTorch Conv3d kaiming-uniform fan_in bound
    conv_w = jax.random.uniform(k_w, (Cout, Cin, 1, 1, 1), dtype=jnp.float32,
                                minval=-bound, maxval=bound)

    ref = _reference(x, gamma, beta, conv_w)
    out = jax.block_until_ready(transition_block3d(x, gamma, beta, conv_w))
    assert out.shape == (N, Cout, D // 2, H // 2, W // 2), out.shape
    err = float(jnp.max(jnp.abs(out - ref)))
    assert jnp.allclose(out, ref, atol=1e-4, rtol=1e-4), err

    # ---- Config B: bf16 activations + bf16 MXU operands (v5e guidance), f32 accum. ----
    x16 = x.astype(jnp.bfloat16)
    out16 = jax.block_until_ready(
        transition_block3d(x16, gamma, beta, conv_w, matmul_dtype=jnp.bfloat16))
    assert out16.dtype == jnp.bfloat16
    err16 = float(jnp.max(jnp.abs(out16.astype(jnp.float32) - ref)))
    assert jnp.allclose(out16.astype(jnp.float32), ref, atol=5e-2, rtol=5e-2), err16

    # ---- Config C: small-spatial fallback (td == Do full-depth blocks), f32. ----
    N2, Cin2, Cout2, D2, H2, W2 = 2, 8, 8, 8, 8, 8
    x2 = jax.random.normal(k_x, (N2, Cin2, D2, H2, W2), dtype=jnp.float32)
    g2 = 1.0 + 0.1 * jax.random.normal(k_g, (Cin2,), dtype=jnp.float32)
    b2 = 0.1 * jax.random.normal(k_b, (Cin2,), dtype=jnp.float32)
    bound2 = 1.0 / math.sqrt(Cin2)
    w2 = jax.random.uniform(k_w, (Cout2, Cin2, 1, 1, 1), dtype=jnp.float32,
                            minval=-bound2, maxval=bound2)
    ref2 = _reference(x2, g2, b2, w2)
    out2 = jax.block_until_ready(transition_block3d(x2, g2, b2, w2))
    err2 = float(jnp.max(jnp.abs(out2 - ref2)))
    assert jnp.allclose(out2, ref2, atol=1e-4, rtol=1e-4), err2

    print("KERNEL_OK")
</pallas_src>

<mosaic_0001>
module attributes {stable_mosaic.version = 11 : i64} {
  func.func @_transition_kernel(%arg0: i32, %arg1: i32, %arg2: memref<1x16x1024xf32, #tpu.memory_space<vmem>>, %arg3: memref<16x2xf32, #tpu.memory_space<vmem>>, %arg4: memref<1024x128xf32, #tpu.memory_space<vmem>>, %arg5: memref<8x16xf32, #tpu.memory_space<vmem>>, %arg6: memref<1x8x128xf32, #tpu.memory_space<vmem>>) attributes {dimension_semantics = [#tpu.dimension_semantics<parallel>, #tpu.dimension_semantics<parallel>], iteration_bounds = array<i64: 2, 2>, scalar_prefetch = 0 : i64, scratch_operands = 0 : i64, tpu.core_type = #tpu.core_type<tc>, window_params = [{transform_indices = @transform_0, window_bounds = array<i64: 1, 16, 1024>}, {pipeline_mode = #tpu.pipeline_mode<synchronous>, transform_indices = @transform_1, window_bounds = array<i64: 16, 2>}, {pipeline_mode = #tpu.pipeline_mode<synchronous>, transform_indices = @transform_2, window_bounds = array<i64: 1024, 128>}, {pipeline_mode = #tpu.pipeline_mode<synchronous>, transform_indices = @transform_3, window_bounds = array<i64: 8, 16>}, {transform_indices = @transform_4, window_bounds = array<i64: 1, 8, 128>}]} {
    %c0 = arith.constant 0 : index
    %c0_0 = arith.constant 0 : index
    %c0_1 = arith.constant 0 : index
    %0 = vector.load %arg2[%c0, %c0_0, %c0_1] : memref<1x16x1024xf32, #tpu.memory_space<vmem>>, vector<1x16x1024xf32>
    %1 = vector.shape_cast %0 : vector<1x16x1024xf32> to vector<16x1024xf32>
    %c0_2 = arith.constant 0 : index
    %c0_3 = arith.constant 0 : index
    %2 = vector.load %arg3[%c0_2, %c0_3] : memref<16x2xf32, #tpu.memory_space<vmem>>, vector<16x1xf32>
    %c0_4 = arith.constant 0 : index
    %c1 = arith.constant 1 : index
    %3 = vector.load %arg3[%c0_4, %c1] : memref<16x2xf32, #tpu.memory_space<vmem>>, vector<16x1xf32>
    %4 = vector.broadcast %2 : vector<16x1xf32> to vector<16x1024xf32>
    %5 = arith.mulf %1, %4 : vector<16x1024xf32>
    %6 = vector.broadcast %3 : vector<16x1xf32> to vector<16x1024xf32>
    %7 = arith.addf %5, %6 : vector<16x1024xf32>
    %cst = arith.constant 0.000000e+00 : f32
    %8 = vector.broadcast %cst : f32 to vector<16x1024xf32>
    %9 = arith.maximumf %7, %8 : vector<16x1024xf32>
    %c0_5 = arith.constant 0 : index
    %c0_6 = arith.constant 0 : index
    %10 = vector.load %arg4[%c0_5, %c0_6] : memref<1024x128xf32, #tpu.memory_space<vmem>>, vector<1024x128xf32>
    %cst_7 = arith.constant dense<0.000000e+00> : vector<16x128xf32>
    %11 = tpu.matmul %9, %10, %cst_7 {dimension_numbers = #tpu.dot_dimension_numbers<[1], [0], [0], [1], [0, 0, 1, 1], [], []>} : vector<16x1024xf32>, vector<1024x128xf32>, vector<16x128xf32> -> vector<16x128xf32>
    %c0_8 = arith.constant 0 : index
    %c0_9 = arith.constant 0 : index
    %12 = vector.load %arg5[%c0_8, %c0_9] : memref<8x16xf32, #tpu.memory_space<vmem>>, vector<8x16xf32>
    %cst_10 = arith.constant dense<0.000000e+00> : vector<8x128xf32>
    %13 = tpu.matmul %12, %11, %cst_10 {dimension_numbers = #tpu.dot_dimension_numbers<[1], [0], [0], [1], [0, 0, 1, 1], [], []>} : vector<8x16xf32>, vector<16x128xf32>, vector<8x128xf32> -> vector<8x128xf32>
    %c0_11 = arith.constant 0 : index
    %c0_12 = arith.constant 0 : index
    %c0_13 = arith.constant 0 : index
    %14 = vector.load %arg6[%c0_11, %c0_12, %c0_13] : memref<1x8x128xf32, #tpu.memory_space<vmem>>, vector<1x8x128xf32>
    %15 = vector.shape_cast %14 : vector<1x8x128xf32> to vector<8x128xf32>
    %16 = vector.shape_cast %13 : vector<8x128xf32> to vector<1x8x128xf32>
    tpu.vector_store %arg6[%c0_11, %c0_12, %c0_13], %16 {strides = array<i32>} : memref<1x8x128xf32, #tpu.memory_space<vmem>>, vector<1x8x128xf32>,
    return
  }
  func.func @transform_0(%arg0: i32, %arg1: i32) -> (i32, i32, i32) {
    %c0_i32 = arith.constant 0 : i32
    %c0_i32_0 = arith.constant 0 : i32
    return %arg0, %c0_i32, %arg1 : i32, i32, i32
  }
  func.func @transform_1(%arg0: i32, %arg1: i32) -> (i32, i32) {
    %c0_i32 = arith.constant 0 : i32
    %c0_i32_0 = arith.constant 0 : i32
    %c0_i32_1 = arith.constant 0 : i32
    return %c0_i32, %c0_i32_0 : i32, i32
  }
  func.func @transform_2(%arg0: i32, %arg1: i32) -> (i32, i32) {
    %c0_i32 = arith.constant 0 : i32
    %c0_i32_0 = arith.constant 0 : i32
    %c0_i32_1 = arith.constant 0 : i32
    return %c0_i32, %c0_i32_0 : i32, i32
  }
  func.func @transform_3(%arg0: i32, %arg1: i32) -> (i32, i32) {
    %c0_i32 = arith.constant 0 : i32
    %c0_i32_0 = arith.constant 0 : i32
    %c0_i32_1 = arith.constant 0 : i32
    return %c0_i32, %c0_i32_0 : i32, i32
  }
  func.func @transform_4(%arg0: i32, %arg1: i32) -> (i32, i32, i32) {
    %c0_i32 = arith.constant 0 : i32
    %c0_i32_0 = arith.constant 0 : i32
    return %arg0, %c0_i32, %arg1 : i32, i32, i32
  }
}

</mosaic_0001>

<bundles_post_ra>
// kernel: tpu_custom_call.1
= control target key start
LH: loop header
LB: loop body
LE: loop exit
PB: predicated region body
PF: predicated region fallthrough
CT: control target
= control target key end

     0   :  { %s1691_s0 = inlined_call_operand.hbm [shape: f32[2,16,2048], index: 0, kind: input, shape index: {}]   ;;  %s1692_s1 = inlined_call_operand.vmem [shape: f32[16,2], index: 1, kind: input, shape index: {}]   ;;  %s1693_s2 = inlined_call_operand.hbm [shape: f32[1024,128], index: 2, kind: input, shape index: {}]   ;;  %s1694_s3 = inlined_call_operand.vmem [shape: f32[8,16], index: 3, kind: input, shape index: {}]   ;;  %s1695_s4 = inlined_call_operand.hbm [shape: f32[2,8,256], index: 4, kind: output, shape index: {}]  }
   0x1   :  { %1708 = sst [smem:[#allocation17_spill]] %s1693_s2 }
   0x2   :  { %1709 = sst [smem:[#allocation18_spill]] %s1695_s4 }
   0x3   :  { %9 = vsyncpa [#allocation3], 0 }
   0x4   :  { %11 = vsyncpa [#allocation3 + $0x1], 0 }
   0x5   :  { %12 = vsyncpa [#allocation6], 0 }
   0x6   :  { %13 = vsyncpa [#allocation4], 0 }
   0x7   :  { %15 = vsyncpa [#allocation4 + $0x1], 0  ;;  %s1426_s15 = smov 0   ;;  %s1428_s16 = smov 0  }
   0x8   :  { %s1430_s17 = smov 0   ;;  %s1432_s18 = smov 0  }
   0x9   :  { %s1434_s19 = smov 0   ;;  %s1436_s20 = smov 0  }
   0xa   :  { %s1438_s21 = smov 0   ;;  %s1440_s22 = smov 0  }
   0xb LB: > { %1710 = sst [smem:[#allocation11_spill]] %s1359_s15  ;;  %s950_s23 = sadd.s32 4294967295, %s1387_s22   ;;  %s1387_s22 = sphi %s1440_s22, %s21_s22   ;;  %s1383_s21 = sphi %s1438_s21, %s1743_s21   ;;  %s1379_s20 = sphi %s1436_s20, %s1742_s20   ;;  %s1375_s19 = sphi %s1434_s19, %s1741_s19   ;;  %s1371_s18 = sphi %s1432_s18, %s1736_s18   ;;  %s1367_s17 = sphi %s1430_s17, %s1740_s17   ;;  %s1363_s16 = sphi %s1428_s16, %s1739_s16   ;;  %s1359_s15 = sphi %s1426_s15, %s1738_s15  }
   0xc   : > { %1711 = sst [smem:[#allocation12_spill]] %s1379_s20  ;;  %s951_s24 = sadd.s32 4294967294, %s1387_s22  }
   0xd   : > { %1712 = sst [smem:[#allocation13_spill]] %s1387_s22  ;;  %p49_p0 = scmp.ne.s32.totalorder %s1367_s17, %s1363_s16 }
   0xe   : > { %p50_p1 = scmp.eq.s32.totalorder %s1387_s22, 0  ;;  %p55_p2 = scmp.ne.s32.totalorder %s1363_s16, %s1359_s15 }
   0xf   : > { %p1474_p3 = scmp.eq.s32.totalorder %s950_s23, 0  ;;  %p144_p4 = scmp.eq.s32.totalorder %s950_s23, 3 }
  0x10   : > { %p1478_p5 = por %p50_p1, %p49_p0  ;;  %p150_p6 = scmp.eq.s32.totalorder %s951_s24, 3 }
  0x11   : > { %p1484_p7 = por %p1474_p3, %p55_p2  ;;  %p1488_p8 = por %p144_p4, %p49_p0 }
  0x12   : > { %p1492_p9 = por %p150_p6, %p55_p2  ;;  %p952_p10 = scmp.ge.s32.totalorder %s1387_s22, 1 }
  0x13   : > { %s1715_s28 = scalar_select %p1484_p7, 1, 0 }
  0x14   : > { %s1716_s29 = scalar_select %p1488_p8, 1, 0 }
  0x15   : > { %s1718_s30 = scalar_select %p1492_p9, 1, 0 }
  0x16   : > { %1717 = sst [smem:[#allocation14_spill]] %s1716_s29  ;;  %p157_p11 = scmp.lt.s32.totalorder %s1387_s22, 5 }
  0x17   : > { %1719 = sst [smem:[#allocation15_spill]] %s1718_s30  ;;  %s1389_s6 = smov [#allocation5]  }
  0x18   : > { %p1498_p12 = pnand %p952_p10, %p157_p11  ;;  %s172_s7 = sshll.u32 %s1389_s6, 4  ;;  %s173_s7 = int_to_ptr.vmem [resolvable:$true] %s172_s7 }
  0x19   : > { %p1152_p0 = scmp.lt.s32.totalorder %s1387_s22, 4  ;;  %s1244_s10 = scalar_lea.vmem %s173_s7, 16384 }
  0x1a   : > { %s1720_s5 = scalar_select %p1498_p12, 1, 0 }
  0x1b   : > { %p1139_p13 = pneg %p1498_p12  ;;  %p1513_p2 = pnand %p1152_p0, %p1478_p5 }
  0x1c   : > { %p1245_p6 = scmp.ne.s32.totalorder %s173_s7, %s1244_s10  ;;  %p1252_p9 = scmp.lt.s32.totalorder %s173_s7, %s173_s7 }
  0x1d   : > { %p1507_p1 = pnand %p1139_p13, %p1474_p3  ;;  %p1253_p8 = scmp.lt.s32.totalorder %s1244_s10, %s1244_s10 }
  0x1f   : > { %p1235_p4 = pneg %p1507_p1  ;;  %p1254_p7 = por %p1253_p8, %p1252_p9 }
  0x21   : > { %p1247_p10 = pnand %p1245_p6, %p1235_p4 }
  0x23   : > { %p1248_p11 = pneg %p1247_p10 }
  0x25   : > { %p1255_p12 = pnand %p1254_p7, %p1248_p11 }
  0x27   : > { %1258 = shalt.err (!%p1255_p12)
}
  0x28   : > { %s1390_s11 = smov 128   ;;  %s1391_s12 = smov 8  }
  0x29   : > { %s1723_s2 = sld [smem:[#allocation17_spill]]  ;;  %s30_s23 = sadd.s32 1, %s1379_s20 }
  0x2a   : > { %p31_p5 = scmp.ge.s32.totalorder %s30_s23, 2  ;;  %s33_s24 = sadd.s32 1, %s1383_s21 }
  0x2b   : > { %s189_s27 = sand.u32 1, %s1367_s17   ;;  %s956_s6 = sshll.u32 %s1379_s20, 3 }
  0x2c   : > { %s1745_s23 = smov (%p31_p5, %s30_s23), 0  ;;  %s1747_s24 = smov (!%p31_p5, %s33_s24), %s1383_s21 }
  0x2d   : > { %1724 = sst [smem:[#allocation16_spill]] %s1745_s23  ;;  %s38_s10 = ssub.s32 %s1379_s20, %s1745_s23 }
  0x2e   : > { %p35_p7 = scmp.ge.s32.totalorder %s1747_s24, 2  ;;  %s955_s8 = sshll.u32 %s189_s27, 7 }
  0x2f   : > { %1142 = dma.hbm_to_vmem [thread:$0]  (!%p1507_p1), %s1723_s2, 16384, %s173_s7, [#allocation6], %s1390_s11, %s1390_s11, %s1391_s12  }
  0x30   : > { %s957_s25 = sshll.u32 %s1383_s21, 5  ;;  %s1749_s24 = smov (%p35_p7, %s1747_s24), 0 }
  0x31   : > { %s199_s7 = sadd.s32 %s957_s25, %s956_s6  ;;  %s193_s11 = scalar_lea.vmem [#allocation2], %s955_s8 }
  0x32   : > { %s202_s12 = sshll.u32 %s193_s11, 4  ;;  %s37_s13 = ssub.s32 %s1383_s21, %s1749_s24  ;;  %s203_s12 = int_to_ptr.vmem [resolvable:$true] %s202_s12 }
  0x33   : > { %s958_s14 = sshll.u32 %s199_s7, 7  ;;  %s39_s2 = sor.u32 %s38_s10, %s37_s13 }
  0x34   : > { %s201_s22 = scalar_lea.hbm %s1691_s0, %s958_s14  ;;  %p40_p8 = scmp.eq.s32.totalorder %s39_s2, 0 }
  0x35   : > { %s1725_s23 = sadd.s32 1, %s1367_s17  ;;  %s190_s4 = scalar_lea.sflag [#allocation3], %s189_s27 }
  0x36   : > { %s1544_s20 = scalar_select %p40_p8, %s1367_s17, %s1725_s23  }
  0x37   : > { %p1261_p9 = pneg %p1513_p2  ;;  %s1272_s29 = scalar_lea.vmem %s203_s12, 2048 }
  0x38   : > { %p1273_p12 = scmp.ne.s32.totalorder %s203_s12, %s1272_s29  ;;  %s1392_s25 = smov [#allocation2]  }
  0x39   : > { %s1277_s6 = sshll.u32 %s1392_s25, 4  ;;  %s1278_s6 = int_to_ptr.vmem [resolvable:$false] %s1277_s6 }
  0x3a   : > { %p1275_p13 = pnand %p1273_p12, %p1261_p9  ;;  %s1279_s10 = scalar_lea.vmem %s1278_s6, 4096 }
  0x3b   : > { %p1280_p1 = scmp.lt.s32.totalorder %s203_s12, %s1278_s6  ;;  %p1281_p4 = scmp.lt.s32.totalorder %s1279_s10, %s1272_s29 }
  0x3c   : > { %p1276_p0 = pneg %p1275_p13 }
  0x3d   : > { %p1282_p6 = por %p1281_p4, %p1280_p1 }
  0x3f   : > { %p1283_p10 = pnand %p1282_p6, %p1276_p0 }
  0x41   : > { %1286 = shalt.err (!%p1283_p10)
}
  0x42   : > { %s1393_s2 = smov 2048   ;;  %s1394_s15 = smov 1024  }
  0x43   : > { %s1395_s30 = smov 64   ;;  %p1726_p11 = scmp.ne.s32.totalorder %s1720_s5, 0 }
  0x44   : > { %1146 = dma.hbm_to_vmem [thread:$0]  (!%p1513_p2), %s201_s22, 2048, %s203_s12, %s190_s4, %s1393_s2, %s1394_s15, %s1395_s30  }
  0x45   : > { %214 = sbr.rel (%p1726_p11) target bundleno = 663 (0x297), region = 36  ;;  %s1553_s23 = sand.u32 (!%p1726_p11), 1, %s1363_s16  }
  0x46   : > { %s960_s27 = sshll.u32 (!%p1726_p11), %s1553_s23, 7  ;;  %s217_s29 = scalar_lea.sflag (!%p1726_p11), [#allocation3], %s1553_s23 }
  0x47   : > { %s1557_s8 = scalar_lea.vmem (!%p1726_p11), [#allocation2], %s960_s27  ;;  %p1727_p5 = scmp.ne.s32.totalorder (!%p1726_p11), %s1715_s28, 0 }
  0x4a   : > { %1346 = dma.done.wait (%p1727_p5), %s217_s29, 2048  }
  0x4b   : > { %1348 = vsyncadd (%p1727_p5), %s217_s29, 4294965248 }
  0x4c   : > { %1350 = dma.done.wait (%p1474_p3), [#allocation6], 16384  }
  0x4d   : > { %1352 = vsyncadd (%p1474_p3), [#allocation6], 4294950912  ;;  %v1396_v0 = vmov 0   ;;  %v266_v1 = vld [vmem:[%s1692_s1] sm:$0xff]  ;;  %v267_v2 = vld [vmem:[%s1692_s1 + $0x8] sm:$0xff]  ;;  %v1397_v11 = vmov 1  }
  0x4e   : > { %1229 = vset.pattern.permute.xlu0 %v1396_v0  ;;  %1231 = vset.pattern.permute.xlu1 %v1396_v0  ;;  %v365_v3 = vld [vmem:[#allocation5 + $0xf8] sm:$0xff]  ;;  %v364_v7 = vld [vmem:[#allocation5 + $0xf0] sm:$0xff]  ;;  %v363_v12 = vld [vmem:[#allocation5 + $0xe8] sm:$0xff]  ;;  %vm1399_vm0 = vmmov 0   ;;  %vm763_vm1 = vcmask 130048   ;;  %s1728_s7 = sld [smem:[#allocation14_spill]] }
  0x4f   : > { %270 = vperm.xlu0 %1229, %v266_v1   ;;  %275 = vperm.xlu1 %1231, %v267_v2   ;;  %v397_v4 = vld [vmem:[#allocation5 + $0x1f8] sm:$0xff]  ;;  %v396_v8 = vld [vmem:[#allocation5 + $0x1f0] sm:$0xff]  ;;  %v395_v13 = vld [vmem:[#allocation5 + $0x1e8] sm:$0xff]  ;;  %s962_s11 = sshll.u32 %s1553_s23, 3  ;;  %s965_s12 = sshll.u32 %s1375_s19, 1 }
  0x50   : > { %v349_v5 = vld [vmem:[#allocation5 + $0x78] sm:$0xff]  ;;  %969 = vmatprep.subr.mxu0 %v365_v3  ;;  %1007 = vmatprep.subr.mxu1 %v397_v4  ;;  %v348_v9 = vld [vmem:[#allocation5 + $0x70] sm:$0xff]  ;;  %v347_v14 = vld [vmem:[#allocation5 + $0x68] sm:$0xff]  ;;  %s850_s13 = sadd.s32 %s1371_s18, %s965_s12  ;;  %s248_s14 = scalar_lea.vmem [#allocation7], %s962_s11 }
  0x51   : > { %v381_v6 = vld [vmem:[#allocation5 + $0x178] sm:$0xff]  ;;  %970 = vmatpush3.msra.mxu0 %v349_v5  ;;  %v380_v10 = vld [vmem:[#allocation5 + $0x170] sm:$0xff]  ;;  %v379_v15 = vld [vmem:[#allocation5 + $0x168] sm:$0xff]  ;;  %s854_s25 = sshll.u32 %s248_s14, 4  ;;  %s966_s6 = sshll.u32 %s850_s13, 7  ;;  %s1635_s25 = int_to_ptr.vmem [resolvable:$true] %s854_s25 }
  0x52   : > { %1008 = vmatpush3.msra.mxu1 %v381_v6  ;;  %971 = vmatprep.subr.mxu0 %v364_v7  ;;  %v362_v16 = vld [vmem:[#allocation5 + $0xe0] sm:$0xff]  ;;  %v361_v20 = vld [vmem:[#allocation5 + $0xd8] sm:$0xff]  ;;  %v360_v24 = vld [vmem:[#allocation5 + $0xd0] sm:$0xff]  ;;  %s1729_s15 = sld [smem:[#allocation18_spill]]  ;;  %s839_s29 = scalar_lea.sflag [#allocation4], %s1553_s23 }
  0x53   : > { %1009 = vmatprep.subr.mxu1 %v396_v8  ;;  %1230 = vset.pattern.permute.xlu0 %v1397_v11  ;;  %v394_v17 = vld [vmem:[#allocation5 + $0x1e0] sm:$0xff]  ;;  %v393_v21 = vld [vmem:[#allocation5 + $0x1d8] sm:$0xff]  ;;  %v392_v25 = vld [vmem:[#allocation5 + $0x1d0] sm:$0xff]  ;;  %s1400_s18 = smov [#allocation7]  }
  0x54   : > { %1232 = vset.pattern.permute.xlu1 %v1397_v11  ;;  %295 = vperm.xlu0 %1230, %v266_v1   ;;  %v346_v18 = vld [vmem:[#allocation5 + $0x60] sm:$0xff]  ;;  %v345_v22 = vld [vmem:[#allocation5 + $0x58] sm:$0xff]  ;;  %v344_v26 = vld [vmem:[#allocation5 + $0x50] sm:$0xff]  ;;  %p1731_p2 = scmp.ne.s32.totalorder %s1728_s7, 0  ;;  %s1291_s19 = sshll.u32 %s1400_s18, 4  ;;  %s1292_s19 = int_to_ptr.vmem [resolvable:$false] %s1291_s19 }
  0x55   : > { %299 = vperm.xlu1 %1232, %v267_v2   ;;  %972 = vmatpush3.msra.mxu0 %v348_v9  ;;  %v378_v19 = vld [vmem:[#allocation5 + $0x160] sm:$0xff]  ;;  %v377_v23 = vld [vmem:[#allocation5 + $0x158] sm:$0xff]  ;;  %v376_v27 = vld [vmem:[#allocation5 + $0x150] sm:$0xff]  ;;  %s1293_s4 = scalar_lea.vmem %s1292_s19, 256  ;;  %p1294_p9 = scmp.lt.s32.totalorder %s1635_s25, %s1292_s19 }
  0x56   : > { %1010 = vmatpush3.msra.mxu1 %v380_v10  ;;  %973 = vmatprep.subr.mxu0 %v363_v12  ;;  %v359_v28 = vld [vmem:[#allocation5 + $0xc8] sm:$0xff]  ;;  %v358_v32 = vld [vmem:[#allocation5 + $0xc0] sm:$0xff]  ;;  %v357_v36 = vld [vmem:[#allocation5 + $0xb8] sm:$0xff] }
  0x57   : > { %1011 = vmatprep.subr.mxu1 %v395_v13  ;;  %974 = vmatpush3.msra.mxu0 %v347_v14  ;;  %v391_v29 = vld [vmem:[#allocation5 + $0x1c8] sm:$0xff]  ;;  %v390_v33 = vld [vmem:[#allocation5 + $0x1c0] sm:$0xff]  ;;  %v389_v37 = vld [vmem:[#allocation5 + $0x1b8] sm:$0xff] }
  0x58   : > { %1012 = vmatpush3.msra.mxu1 %v379_v15  ;;  %975 = vmatprep.subr.mxu0 %v362_v16  ;;  %v343_v30 = vld [vmem:[#allocation5 + $0x48] sm:$0xff]  ;;  %v342_v34 = vld [vmem:[#allocation5 + $0x40] sm:$0xff]  ;;  %v341_v38 = vld [vmem:[#allocation5 + $0x38] sm:$0xff]  ;;  %s1730_s30 = smov %s1729_s15  ;;  %s1640_s27 = scalar_lea.hbm %s1729_s15, %s966_s6 }
  0x59   : > { %1013 = vmatprep.subr.mxu1 %v394_v17  ;;  %976 = vmatpush3.msra.mxu0 %v346_v18  ;;  %v375_v31 = vld [vmem:[#allocation5 + $0x148] sm:$0xff]  ;;  %v374_v35 = vld [vmem:[#allocation5 + $0x140] sm:$0xff]  ;;  %v373_v39 = vld [vmem:[#allocation5 + $0x138] sm:$0xff] }
  0x5a   : > { %1014 = vmatpush3.msra.mxu1 %v378_v19  ;;  %977 = vmatprep.subr.mxu0 %v361_v20  ;;  %v356_v40 = vld [vmem:[#allocation5 + $0xb0] sm:$0xff]  ;;  %v355_v44 = vld [vmem:[#allocation5 + $0xa8] sm:$0xff]  ;;  %v354_v48 = vld [vmem:[#allocation5 + $0xa0] sm:$0xff] }
  0x5b   : > { %1015 = vmatprep.subr.mxu1 %v393_v21  ;;  %978 = vmatpush3.msra.mxu0 %v345_v22  ;;  %v388_v41 = vld [vmem:[#allocation5 + $0x1b0] sm:$0xff]  ;;  %v387_v45 = vld [vmem:[#allocation5 + $0x1a8] sm:$0xff]  ;;  %v386_v49 = vld [vmem:[#allocation5 + $0x1a0] sm:$0xff] }
  0x5c   : > { %1016 = vmatpush3.msra.mxu1 %v377_v23  ;;  %979 = vmatprep.subr.mxu0 %v360_v24  ;;  %v340_v42 = vld [vmem:[#allocation5 + $0x30] sm:$0xff]  ;;  %v339_v46 = vld [vmem:[#allocation5 + $0x28] sm:$0xff]  ;;  %v338_v50 = vld [vmem:[#allocation5 + $0x20] sm:$0xff] }
  0x5d   : > { %1017 = vmatprep.subr.mxu1 %v392_v25  ;;  %980 = vmatpush3.msra.mxu0 %v344_v26  ;;  %v372_v43 = vld [vmem:[#allocation5 + $0x130] sm:$0xff]  ;;  %v371_v47 = vld [vmem:[#allocation5 + $0x128] sm:$0xff]  ;;  %v370_v51 = vld [vmem:[#allocation5 + $0x120] sm:$0xff] }
  0x5e   : > { %1018 = vmatpush3.msra.mxu1 %v376_v27  ;;  %981 = vmatprep.subr.mxu0 %v359_v28  ;;  %v353_v52 = vld [vmem:[#allocation5 + $0x98] sm:$0xff]  ;;  %v352_v56 = vld [vmem:[#allocation5 + $0x90] sm:$0xff]  ;;  %v351_v60 = vld [vmem:[#allocation5 + $0x88] sm:$0xff] }
  0x5f   : > { %1019 = vmatprep.subr.mxu1 %v391_v29  ;;  %982 = vmatpush3.msra.mxu0 %v343_v30  ;;  %v385_v53 = vld [vmem:[#allocation5 + $0x198] sm:$0xff]  ;;  %v384_v57 = vld [vmem:[#allocation5 + $0x190] sm:$0xff]  ;;  %v383_v61 = vld [vmem:[#allocation5 + $0x188] sm:$0xff] }
  0x60   : > { %1020 = vmatpush3.msra.mxu1 %v375_v31  ;;  %983 = vmatprep.subr.mxu0 %v358_v32  ;;  %v337_v54 = vld [vmem:[#allocation5 + $0x18] sm:$0xff]  ;;  %v336_v58 = vld [vmem:[#allocation5 + $0x10] sm:$0xff]  ;;  %v335_v62 = vld [vmem:[#allocation5 + $0x8] sm:$0xff] }
  0x61   : > { %1021 = vmatprep.subr.mxu1 %v390_v33  ;;  %984 = vmatpush3.msra.mxu0 %v342_v34  ;;  %v369_v55 = vld [vmem:[#allocation5 + $0x118] sm:$0xff]  ;;  %v368_v59 = vld [vmem:[#allocation5 + $0x110] sm:$0xff]  ;;  %v367_v63 = vld [vmem:[#allocation5 + $0x108] sm:$0xff] }
  0x62   : > { %1022 = vmatpush3.msra.mxu1 %v374_v35  ;;  %985 = vmatprep.subr.mxu0 %v357_v36  ;;  %v350_v0 = vld [vmem:[#allocation5 + $0x80] sm:$0xff]  ;;  %v429_v4 = vld [vmem:[#allocation5 + $0x2f8] sm:$0xff]  ;;  %v251_v8 = vld [vmem:[%s1557_s8 + $0x8] sm:$0xff] }
  0x63   : > { %1023 = vmatprep.subr.mxu1 %v389_v37  ;;  %986 = vmatpush3.msra.mxu0 %v341_v38  ;;  %v382_v1 = vld [vmem:[#allocation5 + $0x180] sm:$0xff]  ;;  %v461_v5 = vld [vmem:[#allocation5 + $0x3f8] sm:$0xff]  ;;  %v259_v9 = vld [vmem:[%s1557_s8 + $0x48] sm:$0xff] }
  0x64   : > { %1024 = vmatpush3.msra.mxu1 %v373_v39  ;;  %987 = vmatprep.subr.mxu0 %v356_v40  ;;  %v334_v2 = vld [vmem:[#allocation5] sm:$0xff]  ;;  %v261_v10 = vld [vmem:[%s1557_s8 + $0x58] sm:$0xff]  ;;  %v252_v13 = vld [vmem:[%s1557_s8 + $0x10] sm:$0xff] }
  0x65   : > { %1025 = vmatprep.subr.mxu1 %v388_v41  ;;  %988 = vmatpush3.msra.mxu0 %v340_v42  ;;  %v366_v3 = vld [vmem:[#allocation5 + $0x100] sm:$0xff]  ;;  %v253_v11 = vld [vmem:[%s1557_s8 + $0x18] sm:$0xff]  ;;  %v260_v15 = vld [vmem:[%s1557_s8 + $0x50] sm:$0xff] }
  0x66   : > { %1026 = vmatpush3.msra.mxu1 %v372_v43  ;;  %989 = vmatprep.subr.mxu0 %v355_v44  ;;  %v250_v12 = vld [vmem:[%s1557_s8] sm:$0xff]  ;;  %v255_v36 = vld [vmem:[%s1557_s8 + $0x28] sm:$0xff]  ;;  %v413_v37 = vld [vmem:[#allocation5 + $0x278] sm:$0xff] }
  0x67   : > { %1027 = vmatprep.subr.mxu1 %v387_v45  ;;  %990 = vmatpush3.msra.mxu0 %v339_v46  ;;  %v258_v14 = vld [vmem:[%s1557_s8 + $0x40] sm:$0xff]  ;;  %v445_v38 = vld [vmem:[#allocation5 + $0x378] sm:$0xff]  ;;  %v428_v42 = vld [vmem:[#allocation5 + $0x2f0] sm:$0xff] }
  0x68   : > { %1028 = vmatpush3.msra.mxu1 %v371_v47  ;;  %991 = vmatprep.subr.mxu0 %v354_v48  ;;  %v257_v41 = vld [vmem:[%s1557_s8 + $0x38] sm:$0xff]  ;;  %v460_v43 = vld [vmem:[#allocation5 + $0x3f0] sm:$0xff] }
  0x69   : > { %1029 = vmatprep.subr.mxu1 %v386_v49  ;;  %992 = vmatpush3.msra.mxu0 %v338_v50  ;;  %v412_v44 = vld [vmem:[#allocation5 + $0x270] sm:$0xff]  ;;  %v427_v50 = vld [vmem:[#allocation5 + $0x2e8] sm:$0xff] }
  0x6a   : > { %1030 = vmatpush3.msra.mxu1 %v370_v51  ;;  %993 = vmatprep.subr.mxu0 %v353_v52  ;;  %v444_v45 = vld [vmem:[#allocation5 + $0x370] sm:$0xff]  ;;  %v459_v51 = vld [vmem:[#allocation5 + $0x3e8] sm:$0xff] }
  0x6b   : > { %1031 = vmatprep.subr.mxu1 %v385_v53  ;;  %994 = vmatpush3.msra.mxu0 %v337_v54 }
  0x6c   : > { %1032 = vmatpush3.msra.mxu1 %v369_v55  ;;  %995 = vmatprep.subr.mxu0 %v352_v56  ;;  %v411_v56 = vld [vmem:[#allocation5 + $0x268] sm:$0xff] }
  0x6d   : > { %1033 = vmatprep.subr.mxu1 %v384_v57  ;;  %996 = vmatpush3.msra.mxu0 %v336_v58  ;;  %v443_v57 = vld [vmem:[#allocation5 + $0x368] sm:$0xff]  ;;  %v426_v58 = vld [vmem:[#allocation5 + $0x2e0] sm:$0xff] }
  0x6e   : > { %1034 = vmatpush3.msra.mxu1 %v368_v59  ;;  %997 = vmatprep.subr.mxu0 %v351_v60  ;;  %v458_v60 = vld [vmem:[#allocation5 + $0x3e0] sm:$0xff] }
  0x6f   : > { %1035 = vmatprep.subr.mxu1 %v383_v61  ;;  %998 = vmatpush3.msra.mxu0 %v335_v62  ;;  %v410_v62 = vld [vmem:[#allocation5 + $0x260] sm:$0xff] }
  0x70   : > { %1036 = vmatpush3.msra.mxu1 %v367_v63  ;;  %999 = vmatprep.subr.mxu0 %v350_v0  ;;  %v442_v63 = vld [vmem:[#allocation5 + $0x360] sm:$0xff]  ;;  %v425_v0 = vld [vmem:[#allocation5 + $0x2d8] sm:$0xff] }
  0x71   : > { %1037 = vmatprep.subr.mxu1 %v382_v1  ;;  %1000 = vmatpush3.msra.mxu0 %v334_v2  ;;  %v457_v1 = vld [vmem:[#allocation5 + $0x3d8] sm:$0xff] }
  0x72   : > { %1038 = vmatpush3.msra.mxu1 %v366_v3  ;;  %1045 = vmatprep.subr.mxu0 %v429_v4  ;;  %v409_v2 = vld [vmem:[#allocation5 + $0x258] sm:$0xff]  ;;  %v424_v4 = vld [vmem:[#allocation5 + $0x2d0] sm:$0xff] }
  0x73   : > { %1083 = vmatprep.subr.mxu1 %v461_v5  ;;  %v441_v3 = vld [vmem:[#allocation5 + $0x358] sm:$0xff]  ;;  %v456_v5 = vld [vmem:[#allocation5 + $0x3d0] sm:$0xff] }
  0xca   : > { %v1573_v6 = vpop.permute.xlu0 %270  ;;  %v1575_v7 = vpop.permute.xlu1 %275 }
  0xcb   : > { %v287_v16 = vmul.f32 %v1575_v7, %v259_v9  ;;  %v289_v17 = vmul.f32 %v1575_v7, %v261_v10  ;;  %v279_v18 = vmul.f32 %v1573_v6, %v251_v8  ;;  %v281_v19 = vmul.f32 %v1573_v6, %v253_v11  ;;  %v408_v8 = vld [vmem:[#allocation5 + $0x250] sm:$0xff]  ;;  %v423_v10 = vld [vmem:[#allocation5 + $0x2c8] sm:$0xff] }
  0xcc   : > { %v278_v20 = vmul.f32 %v1573_v6, %v250_v12  ;;  %v280_v21 = vmul.f32 %v1573_v6, %v252_v13  ;;  %v286_v24 = vmul.f32 %v1575_v7, %v258_v14  ;;  %v288_v25 = vmul.f32 %v1575_v7, %v260_v15  ;;  %v440_v9 = vld [vmem:[#allocation5 + $0x350] sm:$0xff]  ;;  %v455_v11 = vld [vmem:[#allocation5 + $0x3c8] sm:$0xff]  ;;  %v422_v14 = vld [vmem:[#allocation5 + $0x2c0] sm:$0xff] }
  0xcd   : > { %v283_v48 = vmul.f32 %v1573_v6, %v255_v36  ;;  %v285_v49 = vmul.f32 %v1573_v6, %v257_v41  ;;  %v407_v12 = vld [vmem:[#allocation5 + $0x248] sm:$0xff]  ;;  %v454_v15 = vld [vmem:[#allocation5 + $0x3c0] sm:$0xff]  ;;  %v417_v36 = vld [vmem:[#allocation5 + $0x298] sm:$0xff] }
  0xce   : > { %v439_v13 = vld [vmem:[#allocation5 + $0x348] sm:$0xff]  ;;  %v256_v41 = vld [vmem:[%s1557_s8 + $0x30] sm:$0xff] }
  0xcf   : > { %v1591_v22 = vpop.permute.xlu0 %295 }
  0xd0   : > { %v1593_v23 = vpop.permute.xlu1 %299  ;;  %v303_v26 = vadd.f32 %v1591_v22, %v279_v18  ;;  %v305_v27 = vadd.f32 %v1591_v22, %v281_v19  ;;  %v302_v28 = vadd.f32 %v1591_v22, %v278_v20  ;;  %v304_v29 = vadd.f32 %v1591_v22, %v280_v21  ;;  %v421_v18 = vld [vmem:[#allocation5 + $0x2b8] sm:$0xff] }
  0xd1   : > { %v311_v30 = vadd.f32 %v1593_v23, %v287_v16  ;;  %v313_v31 = vadd.f32 %v1593_v23, %v289_v17  ;;  %v310_v39 = vadd.f32 %v1593_v23, %v286_v24  ;;  %v312_v40 = vadd.f32 %v1593_v23, %v288_v25  ;;  %v406_v16 = vld [vmem:[#allocation5 + $0x240] sm:$0xff]  ;;  %v453_v19 = vld [vmem:[#allocation5 + $0x3b8] sm:$0xff]  ;;  %v420_v24 = vld [vmem:[#allocation5 + $0x2b0] sm:$0xff] }
  0xd2   : > { %v319_v32 = vmax.f32 %v303_v26, 0.0  ;;  %v321_v33 = vmax.f32 %v305_v27, 0.0  ;;  %v318_v34 = vmax.f32 %v302_v28, 0.0  ;;  %v320_v35 = vmax.f32 %v304_v29, 0.0  ;;  %v438_v17 = vld [vmem:[#allocation5 + $0x340] sm:$0xff]  ;;  %v405_v20 = vld [vmem:[#allocation5 + $0x238] sm:$0xff] }
  0xd3   : > { %v327_v46 = vmax.f32 %v311_v30, 0.0  ;;  %v329_v47 = vmax.f32 %v313_v31, 0.0  ;;  %v326_v52 = vmax.f32 %v310_v39, 0.0  ;;  %v328_v53 = vmax.f32 %v312_v40, 0.0  ;;  %v437_v21 = vld [vmem:[#allocation5 + $0x338] sm:$0xff]  ;;  %v452_v25 = vld [vmem:[#allocation5 + $0x3b0] sm:$0xff] }
  0xd4   : > { %526 = vmatprep.mubr.f32.mxu0 %v319_v32  ;;  %601 = vmatprep.mubr.f32.mxu1 %v321_v33  ;;  %v307_v54 = vadd.f32 %v1591_v22, %v283_v48  ;;  %v309_v55 = vadd.f32 %v1591_v22, %v285_v49  ;;  %v404_v26 = vld [vmem:[#allocation5 + $0x230] sm:$0xff]  ;;  %v419_v28 = vld [vmem:[#allocation5 + $0x2a8] sm:$0xff]  ;;  %v418_v32 = vld [vmem:[#allocation5 + $0x2a0] sm:$0xff] }
  0xd5   : > { %527 = vmatmul.mubr.f32.vlgmr.msra.gmra.mxu0 %v318_v34  ;;  %602 = vmatmul.mubr.f32.vlgmr.msra.gmra.mxu1 %v320_v35  ;;  %v436_v27 = vld [vmem:[#allocation5 + $0x330] sm:$0xff]  ;;  %v451_v29 = vld [vmem:[#allocation5 + $0x3a8] sm:$0xff]  ;;  %v450_v33 = vld [vmem:[#allocation5 + $0x3a0] sm:$0xff] }
  0xd6   : > { %1046 = vmatpush3.msra.mxu0 %v413_v37  ;;  %1084 = vmatpush3.msra.mxu1 %v445_v38  ;;  %v323_v59 = vmax.f32 %v307_v54, 0.0  ;;  %v325_v61 = vmax.f32 %v309_v55, 0.0  ;;  %v403_v30 = vld [vmem:[#allocation5 + $0x228] sm:$0xff]  ;;  %v402_v34 = vld [vmem:[#allocation5 + $0x220] sm:$0xff]  ;;  %v265_v38 = vld [vmem:[%s1557_s8 + $0x78] sm:$0xff] }
  0xd7   : > { %1047 = vmatprep.subr.mxu0 %v428_v42  ;;  %1085 = vmatprep.subr.mxu1 %v460_v43  ;;  %v435_v31 = vld [vmem:[#allocation5 + $0x328] sm:$0xff]  ;;  %v434_v35 = vld [vmem:[#allocation5 + $0x320] sm:$0xff]  ;;  %v449_v39 = vld [vmem:[#allocation5 + $0x398] sm:$0xff]  ;;  %v293_v48 = vmul.f32 %v1575_v7, %v265_v38 }
  0xd8   : > { %1048 = vmatpush3.msra.mxu0 %v412_v44  ;;  %1086 = vmatpush3.msra.mxu1 %v444_v45  ;;  %v263_v37 = vld [vmem:[%s1557_s8 + $0x68] sm:$0xff]  ;;  %v254_v40 = vld [vmem:[%s1557_s8 + $0x20] sm:$0xff]  ;;  %v401_v42 = vld [vmem:[#allocation5 + $0x218] sm:$0xff] }
  0xd9   : > { %531 = vmatprep.mubr.f32.mxu0 %v327_v46  ;;  %606 = vmatprep.mubr.f32.mxu1 %v329_v47  ;;  %v433_v43 = vld [vmem:[#allocation5 + $0x318] sm:$0xff]  ;;  %v262_v44 = vld [vmem:[%s1557_s8 + $0x60] sm:$0xff]  ;;  %v416_v45 = vld [vmem:[#allocation5 + $0x290] sm:$0xff]  ;;  %v291_v47 = vmul.f32 %v1575_v7, %v263_v37 }
  0xda   : > { %1049 = vmatprep.subr.mxu0 %v427_v50  ;;  %1087 = vmatprep.subr.mxu1 %v459_v51  ;;  %v448_v46 = vld [vmem:[#allocation5 + $0x390] sm:$0xff]  ;;  %v415_v54 = vld [vmem:[#allocation5 + $0x288] sm:$0xff] }
  0xdb   : > { %532 = vmatmul.mubr.f32.gmra.mxu0 %v326_v52  ;;  %607 = vmatmul.mubr.f32.gmra.mxu1 %v328_v53  ;;  %v264_v49 = vld [vmem:[%s1557_s8 + $0x70] sm:$0xff]  ;;  %v282_v52 = vmul.f32 %v1573_v6, %v254_v40  ;;  %v284_v53 = vmul.f32 %v1573_v6, %v256_v41  ;;  %v447_v55 = vld [vmem:[#allocation5 + $0x388] sm:$0xff]  ;;  %v446_v6 = vld [vmem:[#allocation5 + $0x380] sm:$0xff]  ;;  %s1287_s8 = scalar_lea.vmem %s1635_s25, 128 }
  0xdc   : > { %1050 = vmatpush3.msra.mxu0 %v411_v56  ;;  %1088 = vmatpush3.msra.mxu1 %v443_v57  ;;  %v400_v50 = vld [vmem:[#allocation5 + $0x210] sm:$0xff]  ;;  %v290_v56 = vmul.f32 %v1575_v7, %v262_v44  ;;  %v399_v57 = vld [vmem:[#allocation5 + $0x208] sm:$0xff]  ;;  %p1288_p3 = scmp.ne.s32.totalorder %s1635_s25, %s1287_s8  ;;  %p1295_p12 = scmp.lt.s32.totalorder %s1293_s4, %s1287_s8 }
  0xdd   : > { %1051 = vmatprep.subr.mxu0 %v426_v58  ;;  %676 = vmatprep.mubr.f32.mxu0 %v323_v59  ;;  %v432_v51 = vld [vmem:[#allocation5 + $0x310] sm:$0xff]  ;;  %v431_v58 = vld [vmem:[#allocation5 + $0x308] sm:$0xff]  ;;  %v306_v59 = vadd.f32 %v1591_v22, %v282_v52 }
  0xde   : > { %1089 = vmatprep.subr.mxu1 %v458_v60  ;;  %751 = vmatprep.mubr.f32.mxu1 %v325_v61  ;;  %v308_v60 = vadd.f32 %v1591_v22, %v284_v53  ;;  %v292_v61 = vmul.f32 %v1575_v7, %v264_v49  ;;  %v314_v7 = vadd.f32 %v1593_v23, %v290_v56  ;;  %p1289_p7 = pnand %p1288_p3, %p1731_p2  ;;  %p1296_p13 = por %p1295_p12, %p1294_p9 }
  0xdf   : > { %1052 = vmatpush3.msra.mxu0 %v410_v62  ;;  %1090 = vmatpush3.msra.mxu1 %v442_v63  ;;  %v414_v62 = vld [vmem:[#allocation5 + $0x280] sm:$0xff]  ;;  %v315_v63 = vadd.f32 %v1593_v23, %v291_v47 }
  0xe0   : > { %1053 = vmatprep.subr.mxu0 %v425_v0  ;;  %1091 = vmatprep.subr.mxu1 %v457_v1  ;;  %v317_v0 = vadd.f32 %v1593_v23, %v293_v48  ;;  %v398_v1 = vld [vmem:[#allocation5 + $0x200] sm:$0xff]  ;;  %v324_v22 = vmax.f32 %v308_v60, 0.0  ;;  %p1290_p8 = pneg %p1289_p7 }
  0xe1   : > { %1054 = vmatpush3.msra.mxu0 %v409_v2  ;;  %1092 = vmatpush3.msra.mxu1 %v441_v3  ;;  %v430_v2 = vld [vmem:[#allocation5 + $0x300] sm:$0xff]  ;;  %v322_v3 = vmax.f32 %v306_v59, 0.0 }
  0xe2   : > { %1055 = vmatprep.subr.mxu0 %v424_v4  ;;  %1093 = vmatprep.subr.mxu1 %v456_v5  ;;  %v316_v4 = vadd.f32 %v1593_v23, %v292_v61  ;;  %v331_v5 = vmax.f32 %v315_v63, 0.0  ;;  %p1297_p0 = pnand %p1296_p13, %p1290_p8 }
  0xe3   : > { %1056 = vmatpush3.msra.mxu0 %v408_v8  ;;  %1094 = vmatpush3.msra.mxu1 %v440_v9  ;;  %v333_v8 = vmax.f32 %v317_v0, 0.0  ;;  %v330_v9 = vmax.f32 %v314_v7, 0.0 }
  0xe4   : > { %1057 = vmatprep.subr.mxu0 %v423_v10  ;;  %1095 = vmatprep.subr.mxu1 %v455_v11  ;;  %v332_v10 = vmax.f32 %v316_v4, 0.0  ;;  %v1398_v11 = vmov 0.0  }
  0xe5   : > { %1058 = vmatpush3.msra.mxu0 %v407_v12  ;;  %1096 = vmatpush3.msra.mxu1 %v439_v13 }
  0xe6   : > { %1059 = vmatprep.subr.mxu0 %v422_v14  ;;  %1097 = vmatprep.subr.mxu1 %v454_v15 }
  0xe7   : > { %1060 = vmatpush3.msra.mxu0 %v406_v16  ;;  %1098 = vmatpush3.msra.mxu1 %v438_v17 }
  0xe8   : > { %1061 = vmatprep.subr.mxu0 %v421_v18  ;;  %1099 = vmatprep.subr.mxu1 %v453_v19 }
  0xe9   : > { %1062 = vmatpush3.msra.mxu0 %v405_v20  ;;  %1100 = vmatpush3.msra.mxu1 %v437_v21 }
  0xea   : > { %1063 = vmatprep.subr.mxu0 %v420_v24  ;;  %1101 = vmatprep.subr.mxu1 %v452_v25 }
  0xeb   : > { %1064 = vmatpush3.msra.mxu0 %v404_v26  ;;  %1102 = vmatpush3.msra.mxu1 %v436_v27 }
  0xec   : > { %1065 = vmatprep.subr.mxu0 %v419_v28  ;;  %1103 = vmatprep.subr.mxu1 %v451_v29 }
  0xed   : > { %1066 = vmatpush3.msra.mxu0 %v403_v30  ;;  %1104 = vmatpush3.msra.mxu1 %v435_v31 }
  0xee   : > { %1067 = vmatprep.subr.mxu0 %v418_v32  ;;  %1105 = vmatprep.subr.mxu1 %v450_v33 }
  0xef   : > { %1068 = vmatpush3.msra.mxu0 %v402_v34  ;;  %1106 = vmatpush3.msra.mxu1 %v434_v35 }
  0xf0   : > { %1069 = vmatprep.subr.mxu0 %v417_v36  ;;  %1107 = vmatprep.subr.mxu1 %v449_v39 }
  0xf1   : > { %1070 = vmatpush3.msra.mxu0 %v401_v42  ;;  %1108 = vmatpush3.msra.mxu1 %v433_v43  ;;  %v762_v43 = vld [vmem:[%s1694_s3] sm:$0xff] }
  0xf2   : > { %1071 = vmatprep.subr.mxu0 %v416_v45  ;;  %1109 = vmatprep.subr.mxu1 %v448_v46 }
  0xf3   : > { %1072 = vmatpush3.msra.mxu0 %v400_v50  ;;  %1110 = vmatpush3.msra.mxu1 %v432_v51 }
  0xf4   : > { %1073 = vmatprep.subr.mxu0 %v415_v54  ;;  %1111 = vmatprep.subr.mxu1 %v447_v55 }
  0xf5   : > { %1074 = vmatpush3.msra.mxu0 %v399_v57  ;;  %1112 = vmatpush3.msra.mxu1 %v431_v58 }
  0xf6   : > { %1075 = vmatprep.subr.mxu0 %v414_v62  ;;  %1113 = vmatprep.subr.mxu1 %v446_v6 }
  0xf7   : > { %1076 = vmatpush3.msra.mxu0 %v398_v1  ;;  %1114 = vmatpush3.msra.mxu1 %v430_v2 }
  0xf8   : > { %677 = vmatmul.mubr.f32.vlgmr.msra.gmra.mxu0 %v322_v3  ;;  %752 = vmatmul.mubr.f32.vlgmr.msra.gmra.mxu1 %v324_v22 }
  0xf9   : > { %681 = vmatprep.mubr.f32.mxu0 %v331_v5  ;;  %756 = vmatprep.mubr.f32.mxu1 %v333_v8 }
  0xfa   : > { %1124 = vmatprep.subr.mxu0 %v1398_v11 }
  0xfc   : > { %682 = vmatmul.mubr.f32.gmra.mxu0 %v330_v9  ;;  %757 = vmatmul.mubr.f32.gmra.mxu1 %v332_v10 }
  0xfd   : > { %1128 = vmatprep.mubr.msk.f32.mxu0 %vm1399_vm0, %v1398_v11 }
 0x195   : > { %v1001_v12 = vpop.f32.mrf.mxu0  ;;  %v1039_v13 = vpop.f32.mrf.mxu1 }
 0x197   : > { %v1002_v14 = vpop.f32.mrf.mxu0  ;;  %v1040_v23 = vpop.f32.mrf.mxu1 }
 0x198   : > { %v1003_v25 = vadd.f32 %v1002_v14, %v1001_v12  ;;  %v1041_v26 = vadd.f32 %v1040_v23, %v1039_v13 }
 0x19a   : > { %v604_v34 = vadd.f32 %v1041_v26, %v1003_v25 }
 0x19b   : > { %v1004_v15 = vpop.f32.mrf.mxu0  ;;  %v1042_v16 = vpop.f32.mrf.mxu1 }
 0x19d   : > { %v1005_v17 = vpop.f32.mrf.mxu0  ;;  %v1043_v18 = vpop.f32.mrf.mxu1 }
 0x19e   : > { %v1006_v27 = vadd.f32 %v1005_v17, %v1004_v15  ;;  %v1044_v28 = vadd.f32 %v1043_v18, %v1042_v16 }
 0x1a0   : > { %v609_v35 = vadd.f32 %v1044_v28, %v1006_v27 }
 0x1b8   : > { %v1077_v19 = vpop.f32.mrf.mxu0  ;;  %v1115_v20 = vpop.f32.mrf.mxu1 }
 0x1ba   : > { %v1078_v21 = vpop.f32.mrf.mxu0  ;;  %v1116_v24 = vpop.f32.mrf.mxu1 }
 0x1bb   : > { %v1079_v31 = vadd.f32 %v1078_v21, %v1077_v19  ;;  %v1117_v40 = vadd.f32 %v1116_v24, %v1115_v20 }
 0x1bc   : > { %v1080_v29 = vpop.f32.mrf.mxu0  ;;  %v1118_v30 = vpop.f32.mrf.mxu1 }
 0x1bd   : > { %v679_v37 = vadd.f32 %v1079_v31, %v604_v34 }
 0x1be   : > { %v1081_v32 = vpop.f32.mrf.mxu0  ;;  %v1119_v33 = vpop.f32.mrf.mxu1 }
 0x1bf   : > { %v1082_v36 = vadd.f32 %v1081_v32, %v1080_v29  ;;  %v1120_v39 = vadd.f32 %v1119_v33, %v1118_v30  ;;  %v754_v42 = vadd.f32 %v1117_v40, %v679_v37 }
 0x1c1   : > { %v684_v38 = vadd.f32 %v1082_v36, %v609_v35 }
 0x1c3   : > { %v759_v41 = vadd.f32 %v1120_v39, %v684_v38 }
 0x1c5   : > { %1125 = vmatpush3.msra.mxu0 %v759_v41 }
 0x1c6   : > { %1126 = vmatprep.subr.mxu0 %v1398_v11 }
 0x1c7   : > { %1127 = vmatpush3.msra.mxu0 %v754_v42 }
 0x1c8   : > { %1129 = vmatmul.mubr.msk.f32.vlgmr.msra.gmra.mxu0 %vm763_vm1, %v762_v43 }
 0x288   : > { %v833_v44 = vpop.f32.mrf.mxu0 }
 0x289   : > { %837 = vst [vmem:[%s248_s14] sm:$0xff] %v833_v44 }
 0x28a   : > { %v1130_v45 = vpop.f32.mrf.mxu0 }
 0x28b   : > { %1300 = shalt.err (!%p1297_p0)
}
 0x28c   : > { %s1301_s22 = scalar_lea.hbm %s1640_s27, 128  ;;  %s1305_s9 = scalar_lea.hbm %s1730_s30, 512 }
 0x28d   : > { %p1302_p1 = scmp.ne.s32.totalorder %s1640_s27, %s1301_s22  ;;  %p1306_p10 = scmp.lt.s32.totalorder %s1640_s27, %s1730_s30 }
 0x28e   : > { %p1307_p11 = scmp.lt.s32.totalorder %s1305_s9, %s1301_s22 }
 0x28f   : > { %p1303_p4 = pnand %p1302_p1, %p1731_p2 }
 0x290   : > { %p1308_p5 = por %p1307_p11, %p1306_p10 }
 0x291   : > { %p1304_p6 = pneg %p1303_p4 }
 0x293   : > { %p1309_p3 = pnand %p1308_p5, %p1304_p6 }
 0x295   : > { %1312 = shalt.err (!%p1309_p3)
}
 0x296   : > { %1137 = dma.vmem_to_hbm [thread:$0]  (%p1731_p2), %s1635_s25, 128, %s1640_s27, %s839_s29  }
 0x297 PF: > { %s1732_s11 = sld [smem:[#allocation13_spill]] }
 0x298   : > { %s1733_s12 = sld [smem:[#allocation11_spill]] }
 0x299   : > { %s1734_s13 = sld [smem:[#allocation15_spill]] }
 0x29d   : > { %p1154_p7 = scmp.ge.s32.totalorder %s1732_s11, 2 }
 0x29e   : > { %s866_s14 = sand.u32 1, %s1733_s12  }
 0x29f   : > { %p1735_p8 = scmp.ne.s32.totalorder %s1734_s13, 0  ;;  %s867_s6 = scalar_lea.sflag [#allocation4], %s866_s14 }
 0x2a1   : > { %p1148_p9 = pnand %p1154_p7, %p1735_p8 }
 0x2a3   : > { %p1149_p12 = pneg %p1148_p9 }
 0x2a5   : > { %1354 = dma.done.wait (%p1149_p12), %s867_s6, 128  }
 0x2a6   : > { %1356 = vsyncadd (%p1149_p12), %s867_s6, 4294967168  ;;  %s21_s22 = sadd.s32 1, %s1732_s11   ;;  %s1736_s18 = sld [smem:[#allocation12_spill]] }
 0x2a7   : > { %p18_p13 = scmp.ge.s32.totalorder %s21_s22, 6   ;;  %s1737_s7 = sld [smem:[#allocation16_spill]] }
 0x2a8   : > { %s1738_s15 = smov %s1363_s16  ;;  %s1739_s16 = smov %s1367_s17 }
 0x2a9   : > { %s1740_s17 = smov %s1544_s20  ;;  %s1741_s19 = smov %s1383_s21 }
 0x2aa   : > { %s1743_s21 = smov %s1749_s24  ;;  %20 = sbr.rel (!%p18_p13) target bundleno = 11 (0xb), region = 85 }
 0x2ad   : > { %s1742_s20 = smov %s1737_s7 }
 0x2af   :  { %872 = vsyncpa [#allocation3], 1 }
 0x2b0   :  { %874 = vsyncpa [#allocation3 + $0x1], 1 }
 0x2b1   :  { %875 = vsyncpa [#allocation6], 1 }
 0x2b2   :  { %876 = vsyncpa [#allocation4], 1 }
 0x2b3   :  { %878 = vsyncpa [#allocation4 + $0x1], 1 }

</bundles_post_ra>
